<compile_context>
chip_gen: v6e
topology: v6e:2x2x1
jax: 0.10.0
libtpu: 0.0.40
codegen_flags: <defaults>
</compile_context>

<pallas_src>
import functools

import jax
import jax.numpy as jnp
from jax.experimental import pallas as pl
from jax.experimental.pallas import tpu as pltpu


# ----------------------------------------------------------------------------
# Kernels
# ----------------------------------------------------------------------------


def se_single_pass_kernel(x_ref, w1_ref, w2_ref, o_ref, *, inv_hw):
    """Batched single-pass SE: pool + FCs + rescale for a (Bt, C, HW) slab.

    x_ref : (Bt, C, HW)  activations (channels on sublanes, spatial on lanes).
    w1_ref: (Cr, C)      fc1.weight, PyTorch (out, in) layout (resident).
    w2_ref: (C, Cr)      fc2.weight, PyTorch (out, in) layout (resident).
    o_ref : (Bt, C, HW)  output.
    """
    xf = x_ref[...].astype(jnp.float32)                           # (Bt, C, HW)

    # Global average pool over the spatial (lane) axis, accumulated in f32.
    pooled = jnp.sum(xf, axis=2) * inv_hw                         # (Bt, C)

    # FC stack over the whole Bt block (one real MXU matmul instead of Bt
    # N=1 mat-vecs).  dot_general contracts the channel dims directly so the
    # PyTorch (out, in) weight layout is consumed without transposes.
    w1 = w1_ref[...].astype(jnp.float32)                          # (Cr, C)
    w2 = w2_ref[...].astype(jnp.float32)                          # (C, Cr)
    h = jax.lax.dot_general(pooled, w1, (((1,), (1,)), ((), ())),
                            preferred_element_type=jnp.float32)   # (Bt, Cr)
    h = jnp.maximum(h, 0.0)
    s = jax.lax.dot_general(h, w2, (((1,), (1,)), ((), ())),
                            preferred_element_type=jnp.float32)   # (Bt, C)
    s = jax.nn.sigmoid(s)

    # Per-channel rescale in f32 (do not round the scale to the input dtype
    # before the multiply); cast once on the way out.
    o_ref[...] = (xf * s[:, :, None]).astype(o_ref.dtype)


def se_pool_fc_kernel(x_ref, w1_ref, w2_ref, s_ref, acc_ref, *, hw, thw):
    """Two-phase fallback, phase 1: HW-tiled pool + FC stack -> s (C, 1).

    Grid is (B, n_hw_tiles); the HW axis is 'arbitrary' (reduction last) and
    acc_ref is the resident f32 accumulator.
    """
    h_idx = pl.program_id(1)

    @pl.when(h_idx == 0)
    def _():
        acc_ref[...] = jnp.zeros_like(acc_ref)

    xf = x_ref[...].astype(jnp.float32)                           # (C, thw)
    if hw % thw != 0:
        # Mask out-of-range spatial positions of the (padded) last tile.
        pos = h_idx * thw + jax.lax.broadcasted_iota(jnp.int32, xf.shape, 1)
        xf = jnp.where(pos < hw, xf, 0.0)
    acc_ref[...] += jnp.sum(xf, axis=1, keepdims=True)            # (C, 1)

    @pl.when(h_idx == pl.num_programs(1) - 1)
    def _():
        pooled = acc_ref[...] * (1.0 / hw)                        # (C, 1)
        hlin = jnp.dot(w1_ref[...].astype(jnp.float32), pooled,
                       preferred_element_type=jnp.float32)        # (Cr, 1)
        hlin = jnp.maximum(hlin, 0.0)
        logits = jnp.dot(w2_ref[...].astype(jnp.float32), hlin,
                         preferred_element_type=jnp.float32)      # (C, 1)
        s_ref[...] = jax.nn.sigmoid(logits)


def se_rescale_kernel(x_ref, s_ref, o_ref):
    """Two-phase fallback, phase 2: streaming per-channel rescale."""
    o_ref[...] = (x_ref[...].astype(jnp.float32) * s_ref[...]).astype(o_ref.dtype)


# ----------------------------------------------------------------------------
# Host-side helpers
# ----------------------------------------------------------------------------


def _vmem_capacity_bytes():
    """Generation-aware VMEM capacity (falls back to the smallest, v7x)."""
    try:
        info = pltpu.get_tpu_info()
        cap = getattr(info, "vmem_capacity_bytes", None)
        if cap:
            return int(cap)
    except Exception:
        pass
    return 64 << 20  # conservative: v7x per-TensorCore VMEM


def _choose_bt(B, bytes_per_batch, target_bytes):
    """Largest divisor of B whose per-step block fits the target; prefer an
    even grid length (v7x megacore splits the 'parallel' batch axis)."""
    best = 1
    for d in range(1, B + 1):
        if B % d == 0 and d * bytes_per_batch <= target_bytes:
            best = d
    if (B // best) % 2 != 0:
        for d in range(best - 1, 0, -1):
            # Accept a smaller block if it makes the grid even and the block
            # does not shrink below ~1/4 of the best single-core choice.
            if B % d == 0 and (B // d) % 2 == 0 and 4 * d >= best:
                best = d
                break
    return best


def _se_single_pass(x, w1, w2, *, vmem_ceiling):
    B, C, HW = x.shape
    Cr = w1.shape[0]
    itemsize = x.dtype.itemsize
    w_bytes = w1.size * w1.dtype.itemsize + w2.size * w2.dtype.itemsize
    bytes_per_batch = C * HW * itemsize

    # Per-step x slab target ~4 MiB: measured DMA efficiency is ~85% of HBM
    # roofline at MiB-scale blocks vs ~29% at 64 KiB blocks.
    target = min(4 << 20,
                 max(bytes_per_batch,
                     (vmem_ceiling - 4 * w_bytes - (4 << 20)) // 4))
    Bt = _choose_bt(B, bytes_per_batch, target)

    block_bytes = Bt * bytes_per_batch
    # double-buffered in + out blocks, f32 temp, resident weights, headroom
    vmem_needed = 4 * block_bytes + Bt * C * HW * 4 + 4 * w_bytes + (4 << 20)
    vmem_limit = int(min(vmem_ceiling, max(vmem_needed, 32 << 20)))

    cost = pl.CostEstimate(
        flops=2 * B * C * HW + 4 * B * C * Cr,          # pool + rescale + FCs
        transcendentals=B * C,                          # sigmoid
        bytes_accessed=2 * B * C * HW * itemsize + w_bytes,
    )

    return pl.pallas_call(
        functools.partial(se_single_pass_kernel, inv_hw=1.0 / HW),
        out_shape=jax.ShapeDtypeStruct((B, C, HW), x.dtype),
        grid_spec=pltpu.PrefetchScalarGridSpec(
            num_scalar_prefetch=0,
            grid=(B // Bt,),
            in_specs=[
                pl.BlockSpec((Bt, C, HW), lambda i: (i, 0, 0)),   # x slab
                pl.BlockSpec((Cr, C), lambda i: (0, 0)),          # w1 (resident)
                pl.BlockSpec((C, Cr), lambda i: (0, 0)),          # w2 (resident)
            ],
            out_specs=pl.BlockSpec((Bt, C, HW), lambda i: (i, 0, 0)),
        ),
        compiler_params=pltpu.CompilerParams(
            dimension_semantics=("parallel",),
            vmem_limit_bytes=vmem_limit,
        ),
        cost_estimate=cost,
    )(x, w1, w2)


def _se_two_phase(x, w1, w2, *, thw, vmem_ceiling):
    """HW-tiled fallback when a full (C, HW) slab exceeds the VMEM budget."""
    B, C, HW = x.shape
    Cr = w1.shape[0]
    itemsize = x.dtype.itemsize
    w_bytes = w1.size * w1.dtype.itemsize + w2.size * w2.dtype.itemsize

    if thw is None:
        t = max(1, (4 << 20) // (C * itemsize))
        if t < HW:
            t = max(128, (t // 128) * 128)   # lane-dense tiles
        thw = min(t, HW)
    thw = min(thw, HW)
    n_hw = pl.cdiv(HW, thw)

    block_bytes = C * thw * itemsize
    vmem_needed = 4 * block_bytes + C * thw * 4 + 4 * w_bytes + (4 << 20)
    vmem_limit = int(min(vmem_ceiling, max(vmem_needed, 32 << 20)))

    # Phase 1: pool over HW tiles (f32 accumulator) + FC stack -> s (B, C, 1).
    s = pl.pallas_call(
        functools.partial(se_pool_fc_kernel, hw=HW, thw=thw),
        out_shape=jax.ShapeDtypeStruct((B, C, 1), jnp.float32),
        grid_spec=pltpu.PrefetchScalarGridSpec(
            num_scalar_prefetch=0,
            grid=(B, n_hw),
            in_specs=[
                pl.BlockSpec((None, C, thw), lambda b, h: (b, 0, h)),
                pl.BlockSpec((Cr, C), lambda b, h: (0, 0)),
                pl.BlockSpec((C, Cr), lambda b, h: (0, 0)),
            ],
            out_specs=pl.BlockSpec((None, C, 1), lambda b, h: (b, 0, 0)),
            scratch_shapes=[pltpu.VMEM((C, 1), jnp.float32)],
        ),
        compiler_params=pltpu.CompilerParams(
            dimension_semantics=("parallel", "arbitrary"),
            vmem_limit_bytes=vmem_limit,
        ),
    )(x, w1, w2)

    # Phase 2: streaming per-channel rescale (costs one extra HBM read of x
    # vs the single-pass path, but both passes stay at HBM roofline).
    out = pl.pallas_call(
        se_rescale_kernel,
        out_shape=jax.ShapeDtypeStruct((B, C, HW), x.dtype),
        grid_spec=pltpu.PrefetchScalarGridSpec(
            num_scalar_prefetch=0,
            grid=(B, n_hw),
            in_specs=[
                pl.BlockSpec((None, C, thw), lambda b, h: (b, 0, h)),
                pl.BlockSpec((None, C, 1), lambda b, h: (b, 0, 0)),
            ],
            out_specs=pl.BlockSpec((None, C, thw), lambda b, h: (b, 0, h)),
        ),
        compiler_params=pltpu.CompilerParams(
            dimension_semantics=("parallel", "parallel"),
            vmem_limit_bytes=vmem_limit,
        ),
    )(x, s)
    return out


# ----------------------------------------------------------------------------
# Public entry point
# ----------------------------------------------------------------------------


def se_block(x_nchw, w1, w2, *, force_two_phase=False, thw=None):
    """SEBlock forward.

    x_nchw: (B, C, H, W)
    w1:     (C//r, C)   fc1.weight (PyTorch (out, in) layout)
    w2:     (C, C//r)   fc2.weight (PyTorch (out, in) layout)
    """
    B, C, H, W = x_nchw.shape
    HW = H * W
    Cr = w1.shape[0]
    assert w1.shape == (Cr, C) and w2.shape == (C, Cr)

    # NCHW-native: collapsing the trailing spatial dims is a free reshape.
    x = x_nchw.reshape(B, C, HW)

    itemsize = x.dtype.itemsize
    w_bytes = w1.size * w1.dtype.itemsize + w2.size * w2.dtype.itemsize
    bytes_per_batch = C * HW * itemsize

    vmem_cap = _vmem_capacity_bytes()
    # Leave headroom for Mosaic internal scratch / semaphores:
    # ~112 MiB ceiling on v5e/v6e (128 MiB physical), ~48 MiB on v7x (64 MiB).
    vmem_ceiling = max(vmem_cap - (16 << 20), 32 << 20)

    # Single-pass is viable if one batch element (double-buffered in + out,
    # plus an f32 temp and the resident weights) fits the budget.
    single_pass_ok = (4 * bytes_per_batch + C * HW * 4 + 4 * w_bytes
                      + (4 << 20)) <= vmem_ceiling

    if force_two_phase or not single_pass_ok:
        out = _se_two_phase(x, w1, w2, thw=thw, vmem_ceiling=vmem_ceiling)
    else:
        out = _se_single_pass(x, w1, w2, vmem_ceiling=vmem_ceiling)

    return out.reshape(B, C, H, W)


def se_block_ref(x_nchw, w1, w2):
    """Pure-JAX reference matching the PyTorch forward exactly."""
    xf = x_nchw.astype(jnp.float32)
    y = jnp.mean(xf, axis=(2, 3))                               # (B, C)
    y = jnp.maximum(y @ w1.astype(jnp.float32).T, 0.0)          # (B, Cr)
    y = jax.nn.sigmoid(y @ w2.astype(jnp.float32).T)            # (B, C)
    return (xf * y[:, :, None, None]).astype(x_nchw.dtype)


if __name__ == "__main__":
    B, C, reduction = 2, 64, 16
    Cr = C // reduction

    key = jax.random.PRNGKey(0)
    kx, kx2, k1, k2 = jax.random.split(key, 4)

    # PyTorch Linear weights in native (out, in) layout (no pre-transpose).
    bound1 = 1.0 / (C ** 0.5)
    bound2 = 1.0 / (Cr ** 0.5)
    w1 = jax.random.uniform(k1, (Cr, C), jnp.float32, -bound1, bound1)  # fc1.weight
    w2 = jax.random.uniform(k2, (C, Cr), jnp.float32, -bound2, bound2)  # fc2.weight

    # Primary path: batched single-pass kernel, lane-dense HW (16*16 = 256).
    x = jax.random.normal(kx, (B, C, 16, 16), dtype=jnp.float32)
    out = jax.block_until_ready(se_block(x, w1, w2))
    ref = se_block_ref(x, w1, w2)
    assert out.shape == x.shape
    assert jnp.allclose(out, ref, atol=1e-5, rtol=1e-5), "single-pass mismatch"

    # Fallback path: forced HW-tiled two-phase kernels, with HW = 144 (not a
    # multiple of the 128-wide tile) so the partial-tile masking is exercised.
    x2 = jax.random.normal(kx2, (B, C, 12, 12), dtype=jnp.float32)
    out2 = jax.block_until_ready(
        se_block(x2, w1, w2, force_two_phase=True, thw=128))
    ref2 = se_block_ref(x2, w1, w2)
    assert out2.shape == x2.shape
    assert jnp.allclose(out2, ref2, atol=1e-5, rtol=1e-5), "two-phase mismatch"

    print("KERNEL_OK")
</pallas_src>

<mosaic_0001>
module attributes {stable_mosaic.version = 11 : i64} {
  func.func @se_single_pass_kernel(%arg0: i32, %arg1: memref<1x64x256xf32, #tpu.memory_space<vmem>>, %arg2: memref<4x64xf32, #tpu.memory_space<vmem>>, %arg3: memref<64x4xf32, #tpu.memory_space<vmem>>, %arg4: memref<1x64x256xf32, #tpu.memory_space<vmem>>) attributes {dimension_semantics = [#tpu.dimension_semantics<parallel>], iteration_bounds = array<i64: 2>, scalar_prefetch = 0 : i64, scratch_operands = 0 : i64, tpu.core_type = #tpu.core_type<tc>, window_params = [{transform_indices = @transform_0, window_bounds = array<i64: 1, 64, 256>}, {pipeline_mode = #tpu.pipeline_mode<synchronous>, transform_indices = @transform_1, window_bounds = array<i64: 4, 64>}, {pipeline_mode = #tpu.pipeline_mode<synchronous>, transform_indices = @transform_2, window_bounds = array<i64: 64, 4>}, {transform_indices = @transform_3, window_bounds = array<i64: 1, 64, 256>}]} {
    %c0 = arith.constant 0 : index
    %c0_0 = arith.constant 0 : index
    %c0_1 = arith.constant 0 : index
    %0 = vector.load %arg1[%c0, %c0_0, %c0_1] : memref<1x64x256xf32, #tpu.memory_space<vmem>>, vector<1x64x256xf32>
    %cst = arith.constant dense<0.000000e+00> : vector<1x64xf32>
    %1 = vector.multi_reduction <add>, %0, %cst [2] : vector<1x64x256xf32> to vector<1x64xf32>
    %cst_2 = arith.constant 3.906250e-03 : f32
    %2 = vector.broadcast %cst_2 : f32 to vector<1x64xf32>
    %3 = arith.mulf %1, %2 : vector<1x64xf32>
    %c0_3 = arith.constant 0 : index
    %c0_4 = arith.constant 0 : index
    %4 = vector.load %arg2[%c0_3, %c0_4] : memref<4x64xf32, #tpu.memory_space<vmem>>, vector<4x64xf32>
    %c0_5 = arith.constant 0 : index
    %c0_6 = arith.constant 0 : index
    %5 = vector.load %arg3[%c0_5, %c0_6] : memref<64x4xf32, #tpu.memory_space<vmem>>, vector<64x4xf32>
    %cst_7 = arith.constant dense<0.000000e+00> : vector<1x4xf32>
    %6 = tpu.matmul %3, %4, %cst_7 {dimension_numbers = #tpu.dot_dimension_numbers<[1], [1], [0], [0], [0, 0, 1, 0], [], []>} : vector<1x64xf32>, vector<4x64xf32>, vector<1x4xf32> -> vector<1x4xf32>
    %cst_8 = arith.constant 0.000000e+00 : f32
    %7 = vector.broadcast %cst_8 : f32 to vector<1x4xf32>
    %8 = arith.maximumf %6, %7 : vector<1x4xf32>
    %cst_9 = arith.constant dense<0.000000e+00> : vector<1x64xf32>
    %9 = tpu.matmul %8, %5, %cst_9 {dimension_numbers = #tpu.dot_dimension_numbers<[1], [1], [0], [0], [0, 0, 1, 0], [], []>} : vector<1x4xf32>, vector<64x4xf32>, vector<1x64xf32> -> vector<1x64xf32>
    %10 = arith.negf %9 : vector<1x64xf32>
    %11 = math.exp %10 : vector<1x64xf32>
    %cst_10 = arith.constant 1.000000e+00 : f32
    %12 = vector.broadcast %cst_10 : f32 to vector<1x64xf32>
    %13 = arith.addf %12, %11 : vector<1x64xf32>
    %14 = arith.divf %12, %13 : vector<1x64xf32>
    %15 = vector.shape_cast %14 : vector<1x64xf32> to vector<1x64x1xf32>
    %16 = vector.broadcast %15 : vector<1x64x1xf32> to vector<1x64x256xf32>
    %17 = arith.mulf %0, %16 : vector<1x64x256xf32>
    %c0_11 = arith.constant 0 : index
    %c0_12 = arith.constant 0 : index
    %c0_13 = arith.constant 0 : index
    %18 = vector.load %arg4[%c0_11, %c0_12, %c0_13] : memref<1x64x256xf32, #tpu.memory_space<vmem>>, vector<1x64x256xf32>
    tpu.vector_store %arg4[%c0_11, %c0_12, %c0_13], %17 {strides = array<i32>} : memref<1x64x256xf32, #tpu.memory_space<vmem>>, vector<1x64x256xf32>,
    return
  }
  func.func @transform_0(%arg0: i32) -> (i32, i32, i32) {
    %c0_i32 = arith.constant 0 : i32
    %c0_i32_0 = arith.constant 0 : i32
    %c0_i32_1 = arith.constant 0 : i32
    return %arg0, %c0_i32, %c0_i32_0 : i32, i32, i32
  }
  func.func @transform_1(%arg0: i32) -> (i32, i32) {
    %c0_i32 = arith.constant 0 : i32
    %c0_i32_0 = arith.constant 0 : i32
    %c0_i32_1 = arith.constant 0 : i32
    return %c0_i32, %c0_i32_0 : i32, i32
  }
  func.func @transform_2(%arg0: i32) -> (i32, i32) {
    %c0_i32 = arith.constant 0 : i32
    %c0_i32_0 = arith.constant 0 : i32
    %c0_i32_1 = arith.constant 0 : i32
    return %c0_i32, %c0_i32_0 : i32, i32
  }
  func.func @transform_3(%arg0: i32) -> (i32, i32, i32) {
    %c0_i32 = arith.constant 0 : i32
    %c0_i32_0 = arith.constant 0 : i32
    %c0_i32_1 = arith.constant 0 : i32
    return %arg0, %c0_i32, %c0_i32_0 : i32, i32, i32
  }
}

</mosaic_0001>

<bundles_post_ra>
// kernel: tpu_custom_call.1
= control target key start
LH: loop header
LB: loop body
LE: loop exit
PB: predicated region body
PF: predicated region fallthrough
CT: control target
= control target key end

     0   :  { %8 = vsyncpa [#allocation3], 0  ;;  %s1176_s0 = inlined_call_operand.hbm [shape: f32[2,64,256], index: 0, kind: input, shape index: {}]   ;;  %s1177_s1 = inlined_call_operand.vmem [shape: f32[4,64], index: 1, kind: input, shape index: {}]   ;;  %s1178_s2 = inlined_call_operand.vmem [shape: f32[64,4], index: 2, kind: input, shape index: {}]   ;;  %s1179_s3 = inlined_call_operand.hbm [shape: f32[2,64,256], index: 3, kind: output, shape index: {}]  }
   0x1   :  { %10 = vsyncpa [#allocation3 + $0x1], 0 }
   0x2   :  { %11 = vsyncpa [#allocation4], 0 }
   0x3   :  { %13 = vsyncpa [#allocation4 + $0x1], 0  ;;  %s885_s12 = smov 0   ;;  %s887_s13 = smov 0  }
   0x4   :  { %s889_s14 = smov 0   ;;  %s891_s15 = smov 0  }
   0x5 LB: > { %s906_s16 = sadd.s32 4294967295, %s855_s15   ;;  %s644_s17 = sadd.s32 4294967294, %s855_s15   ;;  %s855_s15 = sphi %s891_s15, %s1194_s15   ;;  %s851_s14 = sphi %s889_s14, %s1193_s14   ;;  %s847_s13 = sphi %s887_s13, %s1192_s13   ;;  %s843_s12 = sphi %s885_s12, %s1191_s12  }
   0x6   : > { %s910_s18 = sadd.s32 1, %s855_s15   ;;  %s26_s19 = sadd.s32 1, %s851_s14 }
   0x7   : > { %s23_s20 = ssub.s32 %s855_s15, %s910_s18  ;;  %p33_p0 = scmp.ne.s32.totalorder %s851_s14, %s847_s13 }
   0x8   : > { %p24_p1 = scmp.eq.s32.totalorder %s23_s20, 0  ;;  %p34_p2 = scmp.eq.s32.totalorder %s855_s15, 0 }
   0x9   : > { %p39_p3 = scmp.ne.s32.totalorder %s847_s13, %s843_s12  ;;  %p40_p4 = scmp.eq.s32.totalorder %s906_s16, 0 }
   0xa   : > { %s922_s21 = scalar_select %p24_p1, %s851_s14, %s26_s19  }
   0xb   : > { %p924_p5 = por %p34_p2, %p33_p0  ;;  %p928_p6 = por %p40_p4, %p39_p3 }
   0xc   : > { %p105_p7 = scmp.eq.s32.totalorder %s906_s16, 1  ;;  %p111_p8 = scmp.eq.s32.totalorder %s644_s17, 1 }
   0xd   : > { %s1183_s23 = scalar_select %p928_p6, 1, 0 }
   0xe   : > { %p719_p10 = scmp.lt.s32.totalorder %s855_s15, 2  ;;  %p935_p11 = por %p105_p7, %p33_p0 }
   0xf   : > { %p939_p12 = por %p111_p8, %p39_p3  ;;  %s137_s26 = sand.u32 1, %s851_s14  }
  0x10   : > { %s1184_s24 = scalar_select %p935_p11, 1, 0 }
  0x11   : > { %s1185_s25 = scalar_select %p939_p12, 1, 0 }
  0x12   : > { %s670_s27 = sshll.u32 %s855_s15, 11  ;;  %s647_s28 = sshll.u32 %s137_s26, 7 }
  0x13   : > { %s948_s4 = scalar_lea.hbm %s1176_s0, %s670_s27  ;;  %s141_s5 = scalar_lea.vmem [#allocation2], %s647_s28 }
  0x14   : > { %s148_s6 = sshll.u32 %s141_s5, 4  ;;  %p952_p13 = pnand %p719_p10, %p924_p5  ;;  %s956_s6 = int_to_ptr.vmem [resolvable:$true] %s148_s6 }
  0x15   : > { %s958_s8 = scalar_lea.sflag [#allocation3], %s137_s26  ;;  %s763_s9 = scalar_lea.hbm %s948_s4, 2048 }
  0x16   : > { %p764_p0 = scmp.ne.s32.totalorder %s948_s4, %s763_s9  ;;  %p765_p1 = pneg %p952_p13 }
  0x17   : > { %s768_s17 = scalar_lea.hbm %s1176_s0, 4096  ;;  %p769_p4 = scmp.lt.s32.totalorder %s948_s4, %s1176_s0 }
  0x18   : > { %p766_p2 = pnand %p765_p1, %p764_p0  ;;  %p770_p5 = scmp.lt.s32.totalorder %s768_s17, %s763_s9 }
  0x1a   : > { %p767_p3 = pneg %p766_p2  ;;  %p771_p7 = por %p770_p5, %p769_p4 }
  0x1c   : > { %p772_p8 = pnand %p771_p7, %p767_p3 }
  0x1e   : > { %775 = shalt.err (!%p772_p8)
}
  0x1f   : > { %s776_s22 = scalar_lea.vmem %s956_s6, 2048  ;;  %s857_s26 = smov [#allocation2]  }
  0x20   : > { %p777_p10 = scmp.ne.s32.totalorder %s956_s6, %s776_s22  ;;  %s781_s27 = sshll.u32 %s857_s26, 4  ;;  %s782_s27 = int_to_ptr.vmem [resolvable:$false] %s781_s27 }
  0x21   : > { %s783_s28 = scalar_lea.vmem %s782_s27, 4096  ;;  %p784_p2 = scmp.lt.s32.totalorder %s956_s6, %s782_s27 }
  0x22   : > { %p779_p9 = pnand %p777_p10, %p765_p1  ;;  %p785_p12 = scmp.lt.s32.totalorder %s783_s28, %s776_s22 }
  0x24   : > { %p780_p0 = pneg %p779_p9  ;;  %p786_p11 = por %p785_p12, %p784_p2 }
  0x26   : > { %p787_p6 = pnand %p786_p11, %p780_p0 }
  0x28   : > { %790 = shalt.err (!%p787_p6)
}
  0x29   : > { %s858_s29 = smov 256   ;;  %s859_s30 = smov 16  }
  0x2a   : > { %714 = dma.hbm_to_vmem [thread:$0]  (!%p952_p13), %s948_s4, 2048, %s956_s6, %s958_s8, %s858_s29, %s858_s29, %s859_s30  }
  0x2b   : > { %p650_p9 = scmp.ge.s32.totalorder %s855_s15, 1  ;;  %p156_p1 = scmp.lt.s32.totalorder %s855_s15, 3 }
  0x2d   : > { %p157_p3 = pnand %p650_p9, %p156_p1 }
  0x2e   : > { %s982_s5 = sand.u32 (!%p157_p3), 1, %s847_s13   ;;  %p1187_p6 = scmp.ne.s32.totalorder (!%p157_p3), %s1183_s23, 0 }
  0x2f   : > { %160 = sbr.rel (%p157_p3) target bundleno = 781 (0x30d), region = 32  ;;  %s651_s9 = sshll.u32 (!%p157_p3), %s982_s5, 7 }
  0x30   : > { %s163_s10 = scalar_lea.sflag (!%p157_p3), [#allocation3], %s982_s5  ;;  %s166_s11 = scalar_lea.vmem (!%p157_p3), [#allocation2], %s651_s9 }
  0x34   : > { %834 = dma.done.wait (%p1187_p6), %s163_s10, 2048  }
  0x35   : > { %836 = vsyncadd (%p1187_p6), %s163_s10, 4294965248  ;;  %v992_v0 = vld [vmem:[%s166_s11] sm:$0xff]  ;;  %v994_v1 = vld [vmem:[%s166_s11 + $0x8] sm:$0xff]  ;;  %v860_v24 = vmov 0.0   ;;  %vm309_vm0 = vcmask 523264   ;;  %vm861_vm1 = vmmov 0   ;;  %v254_v33 = vlaneseq }
  0x36   : > { %v996_v2 = vld [vmem:[%s166_s11 + $0x20] sm:$0xff]  ;;  %v205_v3 = vadd.f32 %v994_v1, %v992_v0  ;;  %v1000_v4 = vld [vmem:[%s166_s11 + $0x28] sm:$0xff]  ;;  %v1002_v5 = vld [vmem:[%s166_s11 + $0x10] sm:$0xff]  ;;  %683 = vmatprep.subr.mxu0 %v860_v24  ;;  %688 = vmatprep.subr.mxu1 %v860_v24  ;;  %vm386_vm2 = vcmask 31744   ;;  %vm265_vm3 = vcmask 130112   ;;  %vm272_vm4 = vcmask 195712  }
  0x37   : > { %v1004_v6 = vld [vmem:[%s166_s11 + $0x18] sm:$0xff]  ;;  %v211_v7 = vadd.f32 %v1000_v4, %v996_v2  ;;  %v1008_v8 = vld [vmem:[%s166_s11 + $0x30] sm:$0xff]  ;;  %v1016_v12 = vld [vmem:[%s166_s11 + $0x40] sm:$0xff]  ;;  %685 = vmatprep.mubr.msk.f32.mxu0 %vm861_vm1, %v860_v24  ;;  %704 = vmatprep.mubr.msk.f32.mxu1 %vm861_vm1, %v860_v24  ;;  %v255_v34 = vand.u32 127, %v254_v33  ;;  %v1072_v35 = vshrl.u32 %v254_v33, 7  ;;  %vm279_vm5 = vcmask 261312  }
  0x38   : > { %v1010_v9 = vld [vmem:[%s166_s11 + $0x38] sm:$0xff]  ;;  %206 = vadd.xlane.f32.xlu0 %v205_v3  ;;  %v208_v10 = vadd.f32 %v1004_v6, %v1002_v5  ;;  %v1018_v13 = vld [vmem:[%s166_s11 + $0x48] sm:$0xff]  ;;  %v1020_v14 = vld [vmem:[%s166_s11 + $0x50] sm:$0xff]  ;;  %vm286_vm6 = vcmask 326912   ;;  %vm293_vm7 = vcmask 392512   ;;  %vm300_vm8 = vcmask 458112  }
  0x39   : > { %212 = vadd.xlane.f32.xlu1 %v211_v7  ;;  %v214_v11 = vadd.f32 %v1010_v9, %v1008_v8  ;;  %v1022_v15 = vld [vmem:[%s166_s11 + $0x58] sm:$0xff]  ;;  %v217_v16 = vadd.f32 %v1018_v13, %v1016_v12  ;;  %v1028_v18 = vld [vmem:[%s166_s11 + $0x60] sm:$0xff]  ;;  %v1030_v19 = vld [vmem:[%s166_s11 + $0x68] sm:$0xff]  ;;  %v260_v36 = vadd.s32 4294967288, %v255_v34  ;;  %v267_v38 = vadd.s32 4294967280, %v255_v34  ;;  %s1096_s6 = scalar_lea.vmem [#allocation5], %s651_s9 }
  0x3a   : > { %v220_v17 = vadd.f32 %v1022_v15, %v1020_v14  ;;  %v1032_v20 = vld [vmem:[%s166_s11 + $0x70] sm:$0xff]  ;;  %v1034_v21 = vld [vmem:[%s166_s11 + $0x78] sm:$0xff]  ;;  %v223_v22 = vadd.f32 %v1030_v19, %v1028_v18  ;;  %v237_v25 = vld [vmem:[%s1177_s1] sm:$0xf]  ;;  %v274_v39 = vadd.s32 4294967272, %v255_v34  ;;  %v258_v41 = vsub.s32 %v255_v34, %v1072_v35  ;;  %s671_s9 = sshll.u32 %s906_s16, 11 }
  0x3b   : > { %v226_v23 = vadd.f32 %v1034_v21, %v1032_v20  ;;  %684 = vmatpush3.xpose.msk.msra.mxu0 %vm309_vm0, %v237_v25  ;;  %v245_v26 = vld [vmem:[%s1178_s2 + $0x38] sm:$0xff]  ;;  %v244_v27 = vld [vmem:[%s1178_s2 + $0x30] sm:$0xff]  ;;  %v243_v28 = vld [vmem:[%s1178_s2 + $0x28] sm:$0xff]  ;;  %v263_v43 = vsub.s32 %v260_v36, %v1072_v35  ;;  %v281_v44 = vadd.s32 4294967264, %v255_v34  ;;  %v270_v45 = vsub.s32 %v267_v38, %v1072_v35  ;;  %s571_s7 = sshll.u32 %s1096_s6, 4  ;;  %s1127_s19 = scalar_lea.hbm %s1179_s3, %s671_s9  ;;  %s1129_s7 = int_to_ptr.vmem [resolvable:$true] %s571_s7 }
  0x3c   : > { %209 = vadd.xlane.f32.xlu0 %v208_v10  ;;  %689 = vmatpush3.xpose.msk.msra.mxu1 %vm386_vm2, %v245_v26  ;;  %v242_v29 = vld [vmem:[%s1178_s2 + $0x20] sm:$0xff]  ;;  %v241_v30 = vld [vmem:[%s1178_s2 + $0x18] sm:$0xff]  ;;  %v240_v31 = vld [vmem:[%s1178_s2 + $0x10] sm:$0xff]  ;;  %v277_v48 = vsub.s32 %v274_v39, %v1072_v35  ;;  %v288_v49 = vadd.s32 4294967256, %v255_v34  ;;  %v295_v56 = vadd.s32 4294967248, %v255_v34  ;;  %v302_v61 = vadd.s32 4294967240, %v255_v34 }
  0x3d   : > { %215 = vadd.xlane.f32.xlu1 %v214_v11  ;;  %690 = vmatprep.subr.mxu1 %v860_v24  ;;  %v239_v32 = vld [vmem:[%s1178_s2 + $0x8] sm:$0xff]  ;;  %v284_v55 = vsub.s32 %v281_v44, %v1072_v35  ;;  %vm307_vm9 = vcmask 523712   ;;  %v238_v34 = vld [vmem:[%s1178_s2] sm:$0xff]  ;;  %v492_v44 = vsub.s32 0, %v1072_v35  ;;  %s558_s16 = scalar_lea.sflag [#allocation4], %s982_s5  ;;  %s791_s20 = scalar_lea.vmem %s1129_s7, 2048 }
  0x3e   : > { %v291_v60 = vsub.s32 %v288_v49, %v1072_v35  ;;  %p792_p11 = scmp.ne.s32.totalorder %s1129_s7, %s791_s20  ;;  %p1188_p12 = scmp.ne.s32.totalorder %s1184_s24, 0 }
  0x3f   : > { %s862_s22 = smov [#allocation5]  }
  0x40   : > { %218 = vadd.xlane.f32.xlu0 %v217_v16  ;;  %691 = vmatpush3.xpose.msk.msra.mxu1 %vm386_vm2, %v244_v27  ;;  %p793_p13 = pnand %p792_p11, %p1188_p12  ;;  %s795_s26 = sshll.u32 %s862_s22, 4  ;;  %s796_s26 = int_to_ptr.vmem [resolvable:$false] %s795_s26 }
  0x41   : > { %221 = vadd.xlane.f32.xlu1 %v220_v17  ;;  %692 = vmatprep.subr.mxu1 %v860_v24  ;;  %v298_v17 = vsub.s32 %v295_v56, %v1072_v35  ;;  %s797_s27 = scalar_lea.vmem %s796_s26, 4096  ;;  %p798_p5 = scmp.lt.s32.totalorder %s1129_s7, %s796_s26 }
  0x42   : > { %p794_p4 = pneg %p793_p13  ;;  %p799_p7 = scmp.lt.s32.totalorder %s797_s27, %s791_s20 }
  0x44   : > { %224 = vadd.xlane.f32.xlu0 %v223_v22  ;;  %693 = vmatpush3.xpose.msk.msra.mxu1 %vm386_vm2, %v243_v28  ;;  %p800_p8 = por %p799_p7, %p798_p5 }
  0x45   : > { %227 = vadd.xlane.f32.xlu1 %v226_v23  ;;  %694 = vmatprep.subr.mxu1 %v860_v24 }
  0x46   : > { %p801_p10 = pnand %p800_p8, %p794_p4 }
  0x48   : > { %695 = vmatpush3.xpose.msk.msra.mxu1 %vm386_vm2, %v242_v29 }
  0x49   : > { %696 = vmatprep.subr.mxu1 %v860_v24 }
  0x4c   : > { %697 = vmatpush3.xpose.msk.msra.mxu1 %vm386_vm2, %v241_v30 }
  0x4d   : > { %698 = vmatprep.subr.mxu1 %v860_v24 }
  0x50   : > { %699 = vmatpush3.xpose.msk.msra.mxu1 %vm386_vm2, %v240_v31 }
  0x51   : > { %700 = vmatprep.subr.mxu1 %v860_v24 }
  0x54   : > { %701 = vmatpush3.xpose.msk.msra.mxu1 %vm386_vm2, %v239_v32 }
  0x55   : > { %702 = vmatprep.subr.mxu1 %v860_v24  ;;  %v305_v24 = vsub.s32 %v302_v61, %v1072_v35 }
  0x58   : > { %703 = vmatpush3.xpose.msk.msra.mxu1 %vm386_vm2, %v238_v34 }
  0xc1   : > { %v207_v37 = vpop.xlane.xlu0 %206 }
  0xc2   : > { %v213_v40 = vpop.xlane.xlu1 %212  ;;  %v229_v42 = vmul.f32 0.00390625, %v207_v37 }
  0xc3   : > { %v231_v46 = vmul.f32 0.00390625, %v213_v40 }
  0xc4   : > { %v259_v53 = vrot.slane %v229_v42, %v258_v41 }
  0xc5   : > { %v210_v47 = vpop.xlane.xlu0 %209  ;;  %v271_v57 = vrot.slane %v231_v46, %v270_v45 }
  0xc6   : > { %v230_v50 = vmul.f32 0.00390625, %v210_v47  ;;  %v216_v51 = vpop.xlane.xlu1 %215 }
  0xc7   : > { %v232_v52 = vmul.f32 0.00390625, %v216_v51 }
  0xc8   : > { %v264_v54 = vrot.slane %v230_v50, %v263_v43 }
  0xc9   : > { %v278_v58 = vrot.slane %v232_v52, %v277_v48  ;;  %v219_v59 = vpop.xlane.xlu0 %218 }
  0xca   : > { %v266_v62 = vsel %vm265_vm3, %v264_v54, %v259_v53  ;;  %v233_v63 = vmul.f32 0.00390625, %v219_v59  ;;  %v222_v3 = vpop.xlane.xlu1 %221 }
  0xcb   : > { %v273_v7 = vsel %vm272_vm4, %v271_v57, %v266_v62  ;;  %v234_v10 = vmul.f32 0.00390625, %v222_v3 }
  0xcc   : > { %v280_v11 = vsel %vm279_vm5, %v278_v58, %v273_v7  ;;  %v285_v16 = vrot.slane %v233_v63, %v284_v55 }
  0xcd   : > { %v292_v22 = vrot.slane %v234_v10, %v291_v60  ;;  %v225_v23 = vpop.xlane.xlu0 %224 }
  0xce   : > { %v287_v25 = vsel %vm286_vm6, %v285_v16, %v280_v11  ;;  %v235_v26 = vmul.f32 0.00390625, %v225_v23  ;;  %v228_v27 = vpop.xlane.xlu1 %227 }
  0xcf   : > { %v236_v28 = vmul.f32 0.00390625, %v228_v27  ;;  %v294_v30 = vsel %vm293_vm7, %v292_v22, %v287_v25 }
  0xd0   : > { %v299_v29 = vrot.slane %v235_v26, %v298_v17 }
  0xd1   : > { %v306_v31 = vrot.slane %v236_v28, %v305_v24 }
  0xd2   : > { %v301_v32 = vsel %vm300_vm8, %v299_v29, %v294_v30 }
  0xd3   : > { %v308_v33 = vsel %vm307_vm9, %v306_v31, %v301_v32 }
  0xd4   : > { %686 = vmatmul.mubr.msk.f32.vlgmr.msra.gmra.mxu0 %vm309_vm0, %v308_v33 }
 0x194   : > { %v381_v36 = vpop.f32.mrf.mxu0 }
 0x195   : > { %v385_v37 = vmax.f32 %v381_v36, 0.0 }
 0x196   : > { %v687_v38 = vpop.f32.mrf.mxu0 }
 0x197   : > { %705 = vmatmul.mubr.msk.f32.vlgmr.msra.gmra.mxu1 %vm386_vm2, %v385_v37 }
 0x257   : > { %v480_v39 = vpop.f32.mrf.mxu1 }
 0x258   : > { %v664_v40 = vmul.f32 -1.442695, %v480_v39 }
 0x259   : > { %v706_v41 = vpop.f32.mrf.mxu1 }
 0x25a   : > { %759 = vpow2.f32 %v664_v40 }
 0x267   : > { %v760_v42 = vpop.eup %759 }
 0x268   : > { %v487_v43 = vadd.f32 1.0, %v760_v42 }
 0x26a   : > { %761 = vrcp.f32 %v487_v43 }
 0x277   : > { %v762_v45 = vpop.eup %761 }
 0x278   : > { %v493_v46 = vrot.slane %v762_v45, %v492_v44 }
 0x27a   : > { %499 = vbcast.lane.b32.xlu1 %v493_v46, 264  ;;  %495 = vbcast.lane.b32.xlu0 %v493_v46, 256 }
 0x27e   : > { %503 = vbcast.lane.b32.xlu1 %v493_v46, 272  ;;  %511 = vbcast.lane.b32.xlu0 %v493_v46, 288 }
 0x282   : > { %507 = vbcast.lane.b32.xlu1 %v493_v46, 280  ;;  %519 = vbcast.lane.b32.xlu0 %v493_v46, 304 }
 0x286   : > { %515 = vbcast.lane.b32.xlu1 %v493_v46, 296 }
 0x28a   : > { %523 = vbcast.lane.b32.xlu1 %v493_v46, 312 }
 0x2ec   : > { %v500_v47 = vpop.permute.xlu1 %499  ;;  %v496_v48 = vpop.permute.xlu0 %495 }
 0x2ed   : > { %v527_v49 = vmul.f32 %v500_v47, %v1002_v5  ;;  %v528_v50 = vmul.f32 %v500_v47, %v1004_v6  ;;  %v525_v51 = vmul.f32 %v496_v48, %v992_v0  ;;  %v526_v35 = vmul.f32 %v496_v48, %v994_v1 }
 0x2ef   : > { %543 = vst [vmem:[%s1096_s6 + $0x10] sm:$0xff] %v527_v49  ;;  %544 = vst [vmem:[%s1096_s6 + $0x18] sm:$0xff] %v528_v50 }
 0x2f0   : > { %541 = vst [vmem:[%s1096_s6] sm:$0xff] %v525_v51  ;;  %542 = vst [vmem:[%s1096_s6 + $0x8] sm:$0xff] %v526_v35  ;;  %v504_v5 = vpop.permute.xlu1 %503  ;;  %v512_v0 = vpop.permute.xlu0 %511 }
 0x2f1   : > { %v529_v1 = vmul.f32 %v504_v5, %v996_v2  ;;  %v530_v6 = vmul.f32 %v504_v5, %v1000_v4  ;;  %v533_v52 = vmul.f32 %v512_v0, %v1016_v12  ;;  %v534_v53 = vmul.f32 %v512_v0, %v1018_v13 }
 0x2f3   : > { %545 = vst [vmem:[%s1096_s6 + $0x20] sm:$0xff] %v529_v1  ;;  %546 = vst [vmem:[%s1096_s6 + $0x28] sm:$0xff] %v530_v6 }
 0x2f4   : > { %549 = vst [vmem:[%s1096_s6 + $0x40] sm:$0xff] %v533_v52  ;;  %550 = vst [vmem:[%s1096_s6 + $0x48] sm:$0xff] %v534_v53  ;;  %v508_v54 = vpop.permute.xlu1 %507  ;;  %v520_v55 = vpop.permute.xlu0 %519 }
 0x2f5   : > { %v531_v2 = vmul.f32 %v508_v54, %v1008_v8  ;;  %v532_v56 = vmul.f32 %v508_v54, %v1010_v9  ;;  %v537_v4 = vmul.f32 %v520_v55, %v1028_v18  ;;  %v538_v12 = vmul.f32 %v520_v55, %v1030_v19 }
 0x2f7   : > { %547 = vst [vmem:[%s1096_s6 + $0x30] sm:$0xff] %v531_v2  ;;  %548 = vst [vmem:[%s1096_s6 + $0x38] sm:$0xff] %v532_v56 }
 0x2f8   : > { %553 = vst [vmem:[%s1096_s6 + $0x60] sm:$0xff] %v537_v4  ;;  %554 = vst [vmem:[%s1096_s6 + $0x68] sm:$0xff] %v538_v12  ;;  %v516_v13 = vpop.permute.xlu1 %515 }
 0x2f9   : > { %v535_v57 = vmul.f32 %v516_v13, %v1020_v14  ;;  %v536_v58 = vmul.f32 %v516_v13, %v1022_v15 }
 0x2fb   : > { %551 = vst [vmem:[%s1096_s6 + $0x50] sm:$0xff] %v535_v57  ;;  %552 = vst [vmem:[%s1096_s6 + $0x58] sm:$0xff] %v536_v58 }
 0x2fc   : > { %v524_v8 = vpop.permute.xlu1 %523 }
 0x2fd   : > { %v539_v9 = vmul.f32 %v524_v8, %v1032_v20  ;;  %v540_v14 = vmul.f32 %v524_v8, %v1034_v21 }
 0x2ff   : > { %555 = vst [vmem:[%s1096_s6 + $0x70] sm:$0xff] %v539_v9  ;;  %556 = vst [vmem:[%s1096_s6 + $0x78] sm:$0xff] %v540_v14 }
 0x300   : > { %804 = shalt.err (!%p801_p10)
}
 0x301   : > { %s805_s28 = scalar_lea.hbm %s1127_s19, 2048  ;;  %s809_s10 = scalar_lea.hbm %s1179_s3, 4096 }
 0x302   : > { %p806_p0 = scmp.ne.s32.totalorder %s1127_s19, %s805_s28  ;;  %p810_p1 = scmp.lt.s32.totalorder %s1127_s19, %s1179_s3 }
 0x303   : > { %p811_p3 = scmp.lt.s32.totalorder %s809_s10, %s805_s28 }
 0x304   : > { %p807_p2 = pnand %p806_p0, %p1188_p12 }
 0x305   : > { %p812_p6 = por %p811_p3, %p810_p1 }
 0x306   : > { %p808_p9 = pneg %p807_p2 }
 0x308   : > { %p813_p11 = pnand %p812_p6, %p808_p9 }
 0x30a   : > { %816 = shalt.err (!%p813_p11)
}
 0x30b   : > { %s863_s4 = smov 256   ;;  %s864_s6 = smov 16  }
 0x30c   : > { %709 = dma.vmem_to_hbm [thread:$0]  (%p1188_p12), %s1129_s7, 2048, %s1127_s19, %s558_s16, %s863_s4, %s863_s4, %s864_s6  }
 0x30d PF: > { %s586_s9 = sand.u32 1, %s843_s12   ;;  %p1189_p13 = scmp.ne.s32.totalorder %s1185_s25, 0 }
 0x30e   : > { %p1190_p4 = scmp.ge.s32.totalorder %s855_s15, 2  ;;  %s587_s8 = scalar_lea.sflag [#allocation4], %s586_s9 }
 0x310   : > { %p716_p5 = pnand %p1190_p4, %p1189_p13 }
 0x312   : > { %p717_p7 = pneg %p716_p5 }
 0x314   : > { %838 = dma.done.wait (%p717_p7), %s587_s8, 2048  }
 0x315   : > { %840 = vsyncadd (%p717_p7), %s587_s8, 4294965248  ;;  %p16_p8 = scmp.ge.s32.totalorder %s910_s18, 4   ;;  %s1191_s12 = smov %s847_s13 }
 0x316   : > { %s1192_s13 = smov %s851_s14  ;;  %s1193_s14 = smov %s922_s21 }
 0x317   : > { %s1194_s15 = smov %s910_s18  ;;  %18 = sbr.rel (!%p16_p8) target bundleno = 5 (0x5), region = 77 }
 0x31c   :  { %592 = vsyncpa [#allocation3], 1 }
 0x31d   :  { %594 = vsyncpa [#allocation3 + $0x1], 1 }
 0x31e   :  { %595 = vsyncpa [#allocation4], 1 }
 0x31f   :  { %597 = vsyncpa [#allocation4 + $0x1], 1 }

</bundles_post_ra>
